<compile_context>
chip_gen: v7x
topology: tpu7x:2x2x1
jax: 0.10.0
libtpu: 0.0.40
codegen_flags: <defaults>
</compile_context>

<pallas_src>
import jax
import jax.numpy as jnp
from jax import lax
from jax.experimental import pallas as pl
from jax.experimental.pallas import tpu as pltpu


def _round_up(x, m):
    return ((x + m - 1) // m) * m


def _vmem_budget_bytes():
    """Per-generation VMEM budget: physical capacity minus headroom, capped."""
    try:
        cap = int(pltpu.get_tpu_info().vmem_capacity_bytes)
    except Exception:
        cap = 128 << 20
    # ~100 MiB on v5e/v6e (128 MiB physical), ~48 MiB on v7x (64 MiB physical).
    return max(16 << 20, min(100 << 20, cap - (16 << 20)))


def _default_block_rows():
    """Row tile: 128 on v5e (4x128x128 MXU), 256 on v6e / v7x (2x256x256 MXU)."""
    try:
        kind = jax.devices()[0].device_kind.lower()
    except Exception:
        kind = ""
    if "v5 lite" in kind or "v5e" in kind or "v5litepod" in kind:
        return 128
    return 256


def _linear_multi_kernel(lo_ref, hi_ref, ids_ref, x_ref, w_ref, b_ref, o_ref):
    # lo_ref / hi_ref : (num_row_tiles,) int32 in SMEM (scalar prefetch).
    # ids_ref : (TM, 1) int32          sorted agent ids of this row tile.
    # x_ref   : (TM, K_pad)            input row tile.
    # w_ref   : (nmodels, K_pad, TN)   weight LUT (full, or one column slab).
    # b_ref   : (nmodels, 1, TN)       bias LUT   (full, or one column slab).
    # o_ref   : (TM, TN)               output tile.
    t = pl.program_id(1)              # row-tile index (grid axis 0 = column axis)
    lo = lo_ref[t]
    hi = hi_ref[t]
    x = x_ref[...]

    @pl.when(lo == hi)
    def _single_group():
        # Common case after sorting: the whole row tile belongs to one group.
        # Dense MXU matmul + bias, direct store (no zero-init / where merge).
        y = jnp.dot(x, w_ref[lo], preferred_element_type=jnp.float32)
        o_ref[...] = (y + b_ref[lo]).astype(o_ref.dtype)

    @pl.when(lo != hi)
    def _multi_group():
        ids = ids_ref[...]                                   # (TM, 1)

        def body(g, acc):
            y = jnp.dot(x, w_ref[g], preferred_element_type=jnp.float32)
            y = y + b_ref[g]
            return jnp.where(ids == g, y, acc)

        # Rows are globally sorted, so every group in [lo, hi] occurs in this
        # tile unless it has zero rows overall.
        # TODO(synk): scalar-prefetch a per-tile group-presence bitmask to skip
        # globally-empty groups for very sparse / imbalanced agent_ids.
        acc = lax.fori_loop(lo, hi + 1, body,
                            jnp.zeros(o_ref.shape, jnp.float32))
        o_ref[...] = acc.astype(o_ref.dtype)


def _build_call(nmodels, n_pad, k_pad, m_pad, tm, tn, out_dtype,
                lut_buffers, vmem_limit):
    num_row_tiles = n_pad // tm
    num_col_tiles = m_pad // tn

    lut_kwargs = {}
    if lut_buffers is not None and hasattr(pl, "Buffered"):
        # Single-buffer the resident LUT (constant index map => fetched once);
        # double-buffer streamed column slabs.
        lut_kwargs = dict(pipeline_mode=pl.Buffered(lut_buffers))

    w_spec = pl.BlockSpec((nmodels, k_pad, tn),
                          lambda j, t, lo, hi: (0, 0, j), **lut_kwargs)
    b_spec = pl.BlockSpec((nmodels, 1, tn),
                          lambda j, t, lo, hi: (0, 0, j), **lut_kwargs)

    return pl.pallas_call(
        _linear_multi_kernel,
        out_shape=jax.ShapeDtypeStruct((n_pad, m_pad), out_dtype),
        grid_spec=pltpu.PrefetchScalarGridSpec(
            num_scalar_prefetch=2,                    # tile_lo, tile_hi -> SMEM
            grid=(num_col_tiles, num_row_tiles),      # column axis outermost
            in_specs=[
                pl.BlockSpec((tm, 1), lambda j, t, lo, hi: (t, 0)),      # ids
                pl.BlockSpec((tm, k_pad), lambda j, t, lo, hi: (t, 0)),  # x
                w_spec,                                                  # W LUT
                b_spec,                                                  # b LUT
            ],
            out_specs=pl.BlockSpec((tm, tn), lambda j, t, lo, hi: (t, j)),
        ),
        compiler_params=pltpu.CompilerParams(
            dimension_semantics=("parallel", "parallel"),
            vmem_limit_bytes=int(vmem_limit)),
    )


def linear_multi(inp, agent_ids, weight_lut, bias_lut, *,
                 block_rows=None, col_block=None, use_bf16=False):
    """out[i] = inp[i] @ weight_lut[agent_ids[i]] + bias_lut[agent_ids[i]].

    inp: (N, sz_in); agent_ids: (N,) int; weight_lut: (nmodels, sz_in, sz_out);
    bias_lut: (nmodels, sz_out).  Returns (N, sz_out).
    """
    n, sz_in = inp.shape
    nmodels, _, sz_out = weight_lut.shape
    out_dtype = inp.dtype

    if n == 0:                                   # degenerate batch
        return jnp.zeros((0, sz_out), out_dtype)

    # MXU operand dtype. bf16 (opt-in) halves LUT VMEM / HBM bytes and hits the
    # native bf16 MXU rate on v6e/v7x; accumulation + bias add stay f32.
    if use_bf16:
        mxu_dtype = jnp.bfloat16
    else:
        mxu_dtype = jnp.promote_types(inp.dtype, weight_lut.dtype)

    # Lane-dense feature padding (multiples of 128); zero padding keeps the
    # math exact (padded K rows of W and padded x columns are zero).
    k_pad = _round_up(max(sz_in, 1), 128)
    m_pad = _round_up(max(sz_out, 1), 128)

    if block_rows is None:
        block_rows = _default_block_rows()
    tm = min(_round_up(block_rows, 8), _round_up(n, 8))
    n_pad = _round_up(n, tm)
    num_row_tiles = n_pad // tm
    pad_rows = n_pad - n

    agent_ids = agent_ids.astype(jnp.int32)

    # Sort rows by agent id so each row tile touches few (usually one) groups.
    if nmodels > 1:
        order = jnp.argsort(agent_ids)
        inv_order = jnp.argsort(order)      # un-sort via gather, not scatter
        ids_sorted = agent_ids[order]
        x_sorted = inp[order]
    else:
        inv_order = None                    # nmodels == 1: no sort needed
        ids_sorted = jnp.zeros((n,), jnp.int32)
        x_sorted = inp

    # Padded tail rows reuse the last real id so they don't widen the final
    # tile's group range (their outputs are discarded below).
    ids_p = jnp.pad(ids_sorted, (0, pad_rows), mode="edge")
    x_p = jnp.zeros((n_pad, k_pad), mxu_dtype).at[:n, :sz_in].set(
        x_sorted.astype(mxu_dtype))

    ids_tiles = ids_p.reshape(num_row_tiles, tm)
    tile_lo = jnp.min(ids_tiles, axis=1).astype(jnp.int32)
    tile_hi = jnp.max(ids_tiles, axis=1).astype(jnp.int32)
    ids2d = ids_p.reshape(n_pad, 1)

    # --- VMEM budgeting: resident single-buffered LUT vs streamed column slabs.
    itemsize_w = jnp.dtype(mxu_dtype).itemsize
    itemsize_o = jnp.dtype(out_dtype).itemsize
    budget = _vmem_budget_bytes()
    headroom = 4 << 20

    def _working_set(tn_, lut_bufs):
        lut = lut_bufs * nmodels * tn_ * (k_pad * itemsize_w + 4)  # W + f32 bias
        x_io = 2 * tm * k_pad * itemsize_w          # double-buffered x tile
        o_io = 2 * tm * tn_ * itemsize_o            # double-buffered out tile
        ids_io = 2 * tm * 4
        return lut + x_io + o_io + ids_io

    if col_block is not None:                       # explicit override (tests)
        tn = min(_round_up(col_block, 128), m_pad)
        lut_buffers = 1 if tn == m_pad else 2
    elif _working_set(m_pad, 1) + headroom <= budget:
        tn, lut_buffers = m_pad, 1                  # full LUT resident, 1 buffer
    else:
        # Stream (nmodels, k_pad, TN) column slabs of W (double-buffered);
        # the column axis is outermost in the grid so slabs change slowly.
        tn = m_pad
        while tn > 128 and _working_set(tn, 2) + headroom > budget:
            tn = _round_up(tn // 2, 128)
        lut_buffers = 2
        # TODO(synk): also tile K (accumulator + pl.when init/finalize) if even
        # a 128-wide column slab of the LUT does not fit VMEM.
    m_pad = _round_up(m_pad, tn)

    w_p = jnp.zeros((nmodels, k_pad, m_pad), mxu_dtype)
    w_p = w_p.at[:, :sz_in, :sz_out].set(weight_lut.astype(mxu_dtype))
    b_p = jnp.zeros((nmodels, 1, m_pad), jnp.float32)
    b_p = b_p.at[:, 0, :sz_out].set(bias_lut.astype(jnp.float32))

    def _run(lut_bufs):
        eff = 2 if lut_bufs is None else lut_bufs
        vmem_limit = min(budget,
                         max(_working_set(tn, eff) + headroom, 16 << 20))
        call = _build_call(nmodels, n_pad, k_pad, m_pad, tm, tn, out_dtype,
                           lut_bufs, vmem_limit)
        return call(tile_lo, tile_hi, ids2d, x_p, w_p, b_p)

    try:
        out_p = _run(lut_buffers)
    except Exception:
        # Robust fallback: default (double-buffered) LUT pipelining if this
        # jax/Mosaic build rejects pipeline_mode=pl.Buffered(...).
        out_p = _run(None)

    if inv_order is None:
        return out_p[:n, :sz_out]
    return jnp.take(out_p, inv_order, axis=0)[:, :sz_out]


def make_params(key, nmodels, sz_in, sz_out, init_std=0.02):
    """Deterministic parameter init (mirrors init_normal of the module)."""
    kw, kb = jax.random.split(key)
    weight_lut = (init_std * jax.random.normal(kw, (nmodels, sz_in * sz_out))
                  ).astype(jnp.float32).reshape(nmodels, sz_in, sz_out)
    bias_lut = (init_std * jax.random.normal(kb, (nmodels, sz_out))
                ).astype(jnp.float32)
    return weight_lut, bias_lut


if __name__ == "__main__":
    key = jax.random.PRNGKey(0)
    nmodels, sz_in, sz_out, n = 4, 32, 32, 8

    k_params, k_inp, k_ids = jax.random.split(key, 3)
    weight_lut, bias_lut = make_params(k_params, nmodels, sz_in, sz_out)
    inp = jax.random.normal(k_inp, (n, sz_in), dtype=jnp.float32)
    agent_ids = jax.random.randint(k_ids, (n,), 0, nmodels, dtype=jnp.int32)

    # Pure-JAX reference: out[i] = inp[i] @ W[ids[i]] + b[ids[i]]
    ref = jnp.einsum("ni,nio->no", inp, weight_lut[agent_ids]) + bias_lut[agent_ids]

    # 1) Multi-model path (resident single-buffered LUT, fori_loop group merge).
    out = jax.block_until_ready(linear_multi(inp, agent_ids, weight_lut, bias_lut))
    assert out.shape == (n, sz_out)
    assert jnp.allclose(out, ref, atol=1e-5, rtol=1e-5)

    # 2) nmodels == 1 path (plain Linear; exercises the single-group fast path).
    w1, b1 = make_params(k_params, 1, sz_in, sz_out)
    out1 = jax.block_until_ready(
        linear_multi(inp, jnp.zeros((n,), jnp.int32), w1, b1))
    ref1 = inp @ w1[0] + b1[0]
    assert jnp.allclose(out1, ref1, atol=1e-5, rtol=1e-5)

    # 3) Column-streamed weight path (forced small column block to exercise the
    #    v7x large-LUT tiling at demo scale).
    sz_out_big = 160
    wc, bc = make_params(k_params, nmodels, sz_in, sz_out_big)
    refc = jnp.einsum("ni,nio->no", inp, wc[agent_ids]) + bc[agent_ids]
    outc = jax.block_until_ready(
        linear_multi(inp, agent_ids, wc, bc, col_block=128))
    assert outc.shape == (n, sz_out_big)
    assert jnp.allclose(outc, refc, atol=1e-5, rtol=1e-5)

    # 4) Optional bf16-operand path (f32 accumulation), looser tolerance.
    outb = jax.block_until_ready(
        linear_multi(inp, agent_ids, weight_lut, bias_lut, use_bf16=True))
    assert jnp.allclose(outb, ref, atol=2e-2, rtol=2e-2)

    print("KERNEL_OK")
</pallas_src>

<mosaic_0001>
module attributes {stable_mosaic.version = 11 : i64} {
  func.func @_linear_multi_kernel(%arg0: i32, %arg1: i32, %arg2: memref<1xi32, #tpu.memory_space<smem>>, %arg3: memref<1xi32, #tpu.memory_space<smem>>, %arg4: memref<8x1xi32, #tpu.memory_space<vmem>>, %arg5: memref<8x128xf32, #tpu.memory_space<vmem>>, %arg6: memref<4x128x128xf32, #tpu.memory_space<vmem>>, %arg7: memref<4x1x128xf32, #tpu.memory_space<vmem>>, %arg8: memref<8x128xf32, #tpu.memory_space<vmem>>) attributes {dimension_semantics = [#tpu.dimension_semantics<parallel>, #tpu.dimension_semantics<parallel>], iteration_bounds = array<i64: 1, 1>, scalar_prefetch = 2 : i64, scratch_operands = 0 : i64, tpu.core_type = #tpu.core_type<tc>, window_params = [{transform_indices = @transform_0, window_bounds = array<i64: 8, 1>}, {transform_indices = @transform_1, window_bounds = array<i64: 8, 128>}, {pipeline_mode = #tpu.pipeline_mode<synchronous>, transform_indices = @transform_2, window_bounds = array<i64: 4, 128, 128>}, {pipeline_mode = #tpu.pipeline_mode<synchronous>, transform_indices = @transform_3, window_bounds = array<i64: 4, 1, 128>}, {transform_indices = @transform_4, window_bounds = array<i64: 8, 128>}]} {
    %0 = arith.index_cast %arg1 : i32 to index
    %1 = memref.load %arg2[%0] : memref<1xi32, #tpu.memory_space<smem>>
    %2 = arith.index_cast %arg1 : i32 to index
    %3 = memref.load %arg3[%2] : memref<1xi32, #tpu.memory_space<smem>>
    %c0 = arith.constant 0 : index
    %c0_0 = arith.constant 0 : index
    %4 = vector.load %arg5[%c0, %c0_0] : memref<8x128xf32, #tpu.memory_space<vmem>>, vector<8x128xf32>
    %5 = arith.cmpi eq, %1, %3 : i32
    %6 = arith.extui %5 : i1 to i32
    %c0_i32 = arith.constant 0 : i32
    %7 = arith.cmpi ne, %6, %c0_i32 : i32
    scf.if %7 {
      %11 = arith.index_cast %1 : i32 to index
      %c0_2 = arith.constant 0 : index
      %c0_3 = arith.constant 0 : index
      %12 = vector.load %arg6[%11, %c0_2, %c0_3] : memref<4x128x128xf32, #tpu.memory_space<vmem>>, vector<1x128x128xf32>
      %13 = vector.shape_cast %12 : vector<1x128x128xf32> to vector<128x128xf32>
      %cst = arith.constant dense<0.000000e+00> : vector<8x128xf32>
      %14 = tpu.matmul %4, %13, %cst {dimension_numbers = #tpu.dot_dimension_numbers<[1], [0], [0], [1], [0, 0, 1, 1], [], []>} : vector<8x128xf32>, vector<128x128xf32>, vector<8x128xf32> -> vector<8x128xf32>
      %15 = arith.index_cast %1 : i32 to index
      %c0_4 = arith.constant 0 : index
      %c0_5 = arith.constant 0 : index
      %16 = vector.load %arg7[%15, %c0_4, %c0_5] : memref<4x1x128xf32, #tpu.memory_space<vmem>>, vector<1x1x128xf32>
      %17 = vector.shape_cast %16 : vector<1x1x128xf32> to vector<1x128xf32>
      %18 = vector.broadcast %17 : vector<1x128xf32> to vector<8x128xf32>
      %19 = arith.addf %14, %18 : vector<8x128xf32>
      %c0_6 = arith.constant 0 : index
      %c0_7 = arith.constant 0 : index
      %20 = vector.load %arg8[%c0_6, %c0_7] : memref<8x128xf32, #tpu.memory_space<vmem>>, vector<8x128xf32>
      tpu.vector_store %arg8[%c0_6, %c0_7], %19 {strides = array<i32>} : memref<8x128xf32, #tpu.memory_space<vmem>>, vector<8x128xf32>,
    } else {
    }
    %8 = arith.cmpi ne, %1, %3 : i32
    %9 = arith.extui %8 : i1 to i32
    %c0_i32_1 = arith.constant 0 : i32
    %10 = arith.cmpi ne, %9, %c0_i32_1 : i32
    scf.if %10 {
      %c0_2 = arith.constant 0 : index
      %c0_3 = arith.constant 0 : index
      %11 = vector.load %arg4[%c0_2, %c0_3] : memref<8x1xi32, #tpu.memory_space<vmem>>, vector<8x1xi32>
      %c1_i32 = arith.constant 1 : i32
      %12 = arith.addi %3, %c1_i32 : i32
      %cst = arith.constant 0.000000e+00 : f32
      %13 = vector.broadcast %cst : f32 to vector<8x128xf32>
      %14 = arith.subi %12, %1 : i32
      %15 = arith.addi %1, %14 : i32
      %c1_i32_4 = arith.constant 1 : i32
      %16 = scf.for %arg9 = %1 to %15 step %c1_i32_4 iter_args(%arg10 = %13) -> (vector<8x128xf32>)  : i32 {
        %18 = arith.index_cast %arg9 : i32 to index
        %c0_7 = arith.constant 0 : index
        %c0_8 = arith.constant 0 : index
        %19 = vector.load %arg6[%18, %c0_7, %c0_8] : memref<4x128x128xf32, #tpu.memory_space<vmem>>, vector<1x128x128xf32>
        %20 = vector.shape_cast %19 : vector<1x128x128xf32> to vector<128x128xf32>
        %cst_9 = arith.constant dense<0.000000e+00> : vector<8x128xf32>
        %21 = tpu.matmul %4, %20, %cst_9 {dimension_numbers = #tpu.dot_dimension_numbers<[1], [0], [0], [1], [0, 0, 1, 1], [], []>} : vector<8x128xf32>, vector<128x128xf32>, vector<8x128xf32> -> vector<8x128xf32>
        %22 = arith.index_cast %arg9 : i32 to index
        %c0_10 = arith.constant 0 : index
        %c0_11 = arith.constant 0 : index
        %23 = vector.load %arg7[%22, %c0_10, %c0_11] : memref<4x1x128xf32, #tpu.memory_space<vmem>>, vector<1x1x128xf32>
        %24 = vector.shape_cast %23 : vector<1x1x128xf32> to vector<1x128xf32>
        %25 = vector.broadcast %24 : vector<1x128xf32> to vector<8x128xf32>
        %26 = arith.addf %21, %25 : vector<8x128xf32>
        %27 = vector.broadcast %arg9 : i32 to vector<8x1xi32>
        %28 = arith.cmpi eq, %11, %27 : vector<8x1xi32>
        %29 = vector.shape_cast %28 : vector<8x1xi1> to vector<8x1xi1>
        %30 = vector.broadcast %29 : vector<8x1xi1> to vector<8x128xi1>
        %31 = arith.select %30, %26, %arg10 : vector<8x128xi1>, vector<8x128xf32>
        scf.yield %31 : vector<8x128xf32>
      }
      %c0_5 = arith.constant 0 : index
      %c0_6 = arith.constant 0 : index
      %17 = vector.load %arg8[%c0_5, %c0_6] : memref<8x128xf32, #tpu.memory_space<vmem>>, vector<8x128xf32>
      tpu.vector_store %arg8[%c0_5, %c0_6], %16 {strides = array<i32>} : memref<8x128xf32, #tpu.memory_space<vmem>>, vector<8x128xf32>,
    } else {
    }
    return
  }
  func.func @transform_0(%arg0: i32, %arg1: i32, %arg2: memref<1xi32, #tpu.memory_space<smem>>, %arg3: memref<1xi32, #tpu.memory_space<smem>>) -> (i32, i32) {
    %c0_i32 = arith.constant 0 : i32
    %c0_i32_0 = arith.constant 0 : i32
    return %arg1, %c0_i32 : i32, i32
  }
  func.func @transform_1(%arg0: i32, %arg1: i32, %arg2: memref<1xi32, #tpu.memory_space<smem>>, %arg3: memref<1xi32, #tpu.memory_space<smem>>) -> (i32, i32) {
    %c0_i32 = arith.constant 0 : i32
    %c0_i32_0 = arith.constant 0 : i32
    return %arg1, %c0_i32 : i32, i32
  }
  func.func @transform_2(%arg0: i32, %arg1: i32, %arg2: memref<1xi32, #tpu.memory_space<smem>>, %arg3: memref<1xi32, #tpu.memory_space<smem>>) -> (i32, i32, i32) {
    %c0_i32 = arith.constant 0 : i32
    %c0_i32_0 = arith.constant 0 : i32
    %c0_i32_1 = arith.constant 0 : i32
    return %c0_i32, %c0_i32_0, %arg0 : i32, i32, i32
  }
  func.func @transform_3(%arg0: i32, %arg1: i32, %arg2: memref<1xi32, #tpu.memory_space<smem>>, %arg3: memref<1xi32, #tpu.memory_space<smem>>) -> (i32, i32, i32) {
    %c0_i32 = arith.constant 0 : i32
    %c0_i32_0 = arith.constant 0 : i32
    %c0_i32_1 = arith.constant 0 : i32
    return %c0_i32, %c0_i32_0, %arg0 : i32, i32, i32
  }
  func.func @transform_4(%arg0: i32, %arg1: i32, %arg2: memref<1xi32, #tpu.memory_space<smem>>, %arg3: memref<1xi32, #tpu.memory_space<smem>>) -> (i32, i32) {
    %c0_i32 = arith.constant 0 : i32
    return %arg1, %arg0 : i32, i32
  }
}

module attributes {stable_mosaic.version = 11 : i64} {
  func.func @_linear_multi_kernel(%arg0: i32, %arg1: i32, %arg2: memref<1xi32, #tpu.memory_space<smem>>, %arg3: memref<1xi32, #tpu.memory_space<smem>>, %arg4: memref<8x1xi32, #tpu.memory_space<vmem>>, %arg5: memref<8x128xf32, #tpu.memory_space<vmem>>, %arg6: memref<4x128x128xf32, #tpu.memory_space<vmem>>, %arg7: memref<4x1x128xf32, #tpu.memory_space<vmem>>, %arg8: memref<8x128xf32, #tpu.memory_space<vmem>>) attributes {dimension_semantics = [#tpu.dimension_semantics<parallel>, #tpu.dimension_semantics<parallel>], iteration_bounds = array<i64: 1, 1>, scalar_prefetch = 2 : i64, scratch_operands = 0 : i64, tpu.core_type = #tpu.core_type<tc>, window_params = [{transform_indices = @transform_0, window_bounds = array<i64: 8, 1>}, {transform_indices = @transform_1, window_bounds = array<i64: 8, 128>}, {transform_indices = @transform_2, window_bounds = array<i64: 4, 128, 128>}, {transform_indices = @transform_3, window_bounds = array<i64: 4, 1, 128>}, {transform_indices = @transform_4, window_bounds = array<i64: 8, 128>}]} {
    %0 = arith.index_cast %arg1 : i32 to index
    %1 = memref.load %arg2[%0] : memref<1xi32, #tpu.memory_space<smem>>
    %2 = arith.index_cast %arg1 : i32 to index
    %3 = memref.load %arg3[%2] : memref<1xi32, #tpu.memory_space<smem>>
    %c0 = arith.constant 0 : index
    %c0_0 = arith.constant 0 : index
    %4 = vector.load %arg5[%c0, %c0_0] : memref<8x128xf32, #tpu.memory_space<vmem>>, vector<8x128xf32>
    %5 = arith.cmpi eq, %1, %3 : i32
    %6 = arith.extui %5 : i1 to i32
    %c0_i32 = arith.constant 0 : i32
    %7 = arith.cmpi ne, %6, %c0_i32 : i32
    scf.if %7 {
      %11 = arith.index_cast %1 : i32 to index
      %c0_2 = arith.constant 0 : index
      %c0_3 = arith.constant 0 : index
      %12 = vector.load %arg6[%11, %c0_2, %c0_3] : memref<4x128x128xf32, #tpu.memory_space<vmem>>, vector<1x128x128xf32>
      %13 = vector.shape_cast %12 : vector<1x128x128xf32> to vector<128x128xf32>
      %cst = arith.constant dense<0.000000e+00> : vector<8x128xf32>
      %14 = tpu.matmul %4, %13, %cst {dimension_numbers = #tpu.dot_dimension_numbers<[1], [0], [0], [1], [0, 0, 1, 1], [], []>} : vector<8x128xf32>, vector<128x128xf32>, vector<8x128xf32> -> vector<8x128xf32>
      %15 = arith.index_cast %1 : i32 to index
      %c0_4 = arith.constant 0 : index
      %c0_5 = arith.constant 0 : index
      %16 = vector.load %arg7[%15, %c0_4, %c0_5] : memref<4x1x128xf32, #tpu.memory_space<vmem>>, vector<1x1x128xf32>
      %17 = vector.shape_cast %16 : vector<1x1x128xf32> to vector<1x128xf32>
      %18 = vector.broadcast %17 : vector<1x128xf32> to vector<8x128xf32>
      %19 = arith.addf %14, %18 : vector<8x128xf32>
      %c0_6 = arith.constant 0 : index
      %c0_7 = arith.constant 0 : index
      %20 = vector.load %arg8[%c0_6, %c0_7] : memref<8x128xf32, #tpu.memory_space<vmem>>, vector<8x128xf32>
      tpu.vector_store %arg8[%c0_6, %c0_7], %19 {strides = array<i32>} : memref<8x128xf32, #tpu.memory_space<vmem>>, vector<8x128xf32>,
    } else {
    }
    %8 = arith.cmpi ne, %1, %3 : i32
    %9 = arith.extui %8 : i1 to i32
    %c0_i32_1 = arith.constant 0 : i32
    %10 = arith.cmpi ne, %9, %c0_i32_1 : i32
    scf.if %10 {
      %c0_2 = arith.constant 0 : index
      %c0_3 = arith.constant 0 : index
      %11 = vector.load %arg4[%c0_2, %c0_3] : memref<8x1xi32, #tpu.memory_space<vmem>>, vector<8x1xi32>
      %c1_i32 = arith.constant 1 : i32
      %12 = arith.addi %3, %c1_i32 : i32
      %cst = arith.constant 0.000000e+00 : f32
      %13 = vector.broadcast %cst : f32 to vector<8x128xf32>
      %14 = arith.subi %12, %1 : i32
      %15 = arith.addi %1, %14 : i32
      %c1_i32_4 = arith.constant 1 : i32
      %16 = scf.for %arg9 = %1 to %15 step %c1_i32_4 iter_args(%arg10 = %13) -> (vector<8x128xf32>)  : i32 {
        %18 = arith.index_cast %arg9 : i32 to index
        %c0_7 = arith.constant 0 : index
        %c0_8 = arith.constant 0 : index
        %19 = vector.load %arg6[%18, %c0_7, %c0_8] : memref<4x128x128xf32, #tpu.memory_space<vmem>>, vector<1x128x128xf32>
        %20 = vector.shape_cast %19 : vector<1x128x128xf32> to vector<128x128xf32>
        %cst_9 = arith.constant dense<0.000000e+00> : vector<8x128xf32>
        %21 = tpu.matmul %4, %20, %cst_9 {dimension_numbers = #tpu.dot_dimension_numbers<[1], [0], [0], [1], [0, 0, 1, 1], [], []>} : vector<8x128xf32>, vector<128x128xf32>, vector<8x128xf32> -> vector<8x128xf32>
        %22 = arith.index_cast %arg9 : i32 to index
        %c0_10 = arith.constant 0 : index
        %c0_11 = arith.constant 0 : index
        %23 = vector.load %arg7[%22, %c0_10, %c0_11] : memref<4x1x128xf32, #tpu.memory_space<vmem>>, vector<1x1x128xf32>
        %24 = vector.shape_cast %23 : vector<1x1x128xf32> to vector<1x128xf32>
        %25 = vector.broadcast %24 : vector<1x128xf32> to vector<8x128xf32>
        %26 = arith.addf %21, %25 : vector<8x128xf32>
        %27 = vector.broadcast %arg9 : i32 to vector<8x1xi32>
        %28 = arith.cmpi eq, %11, %27 : vector<8x1xi32>
        %29 = vector.shape_cast %28 : vector<8x1xi1> to vector<8x1xi1>
        %30 = vector.broadcast %29 : vector<8x1xi1> to vector<8x128xi1>
        %31 = arith.select %30, %26, %arg10 : vector<8x128xi1>, vector<8x128xf32>
        scf.yield %31 : vector<8x128xf32>
      }
      %c0_5 = arith.constant 0 : index
      %c0_6 = arith.constant 0 : index
      %17 = vector.load %arg8[%c0_5, %c0_6] : memref<8x128xf32, #tpu.memory_space<vmem>>, vector<8x128xf32>
      tpu.vector_store %arg8[%c0_5, %c0_6], %16 {strides = array<i32>} : memref<8x128xf32, #tpu.memory_space<vmem>>, vector<8x128xf32>,
    } else {
    }
    return
  }
  func.func @transform_0(%arg0: i32, %arg1: i32, %arg2: memref<1xi32, #tpu.memory_space<smem>>, %arg3: memref<1xi32, #tpu.memory_space<smem>>) -> (i32, i32) {
    %c0_i32 = arith.constant 0 : i32
    %c0_i32_0 = arith.constant 0 : i32
    return %arg1, %c0_i32 : i32, i32
  }
  func.func @transform_1(%arg0: i32, %arg1: i32, %arg2: memref<1xi32, #tpu.memory_space<smem>>, %arg3: memref<1xi32, #tpu.memory_space<smem>>) -> (i32, i32) {
    %c0_i32 = arith.constant 0 : i32
    %c0_i32_0 = arith.constant 0 : i32
    return %arg1, %c0_i32 : i32, i32
  }
  func.func @transform_2(%arg0: i32, %arg1: i32, %arg2: memref<1xi32, #tpu.memory_space<smem>>, %arg3: memref<1xi32, #tpu.memory_space<smem>>) -> (i32, i32, i32) {
    %c0_i32 = arith.constant 0 : i32
    %c0_i32_0 = arith.constant 0 : i32
    %c0_i32_1 = arith.constant 0 : i32
    return %c0_i32, %c0_i32_0, %arg0 : i32, i32, i32
  }
  func.func @transform_3(%arg0: i32, %arg1: i32, %arg2: memref<1xi32, #tpu.memory_space<smem>>, %arg3: memref<1xi32, #tpu.memory_space<smem>>) -> (i32, i32, i32) {
    %c0_i32 = arith.constant 0 : i32
    %c0_i32_0 = arith.constant 0 : i32
    %c0_i32_1 = arith.constant 0 : i32
    return %c0_i32, %c0_i32_0, %arg0 : i32, i32, i32
  }
  func.func @transform_4(%arg0: i32, %arg1: i32, %arg2: memref<1xi32, #tpu.memory_space<smem>>, %arg3: memref<1xi32, #tpu.memory_space<smem>>) -> (i32, i32) {
    %c0_i32 = arith.constant 0 : i32
    return %arg1, %arg0 : i32, i32
  }
}

</mosaic_0001>

<bundles_post_ra>
// kernel: tpu_custom_call.1
= control target key start
LH: loop header
LB: loop body
LE: loop exit
PB: predicated region body
PF: predicated region fallthrough
CT: control target
= control target key end

     0   :  { %13 = vsyncpa [#allocation6], 0  ;;  %s737_s0 = inlined_call_operand.<no memory space> [shape: s32[1], index: 0, kind: input, shape index: {}]   ;;  %s738_s1 = inlined_call_operand.<no memory space> [shape: s32[1], index: 1, kind: input, shape index: {}]   ;;  %s739_s2 = inlined_call_operand.vmem [shape: s32[8,1], index: 2, kind: input, shape index: {}]   ;;  %s740_s3 = inlined_call_operand.vmem [shape: f32[8,128], index: 3, kind: input, shape index: {}]   ;;  %s741_s4 = inlined_call_operand.hbm [shape: f32[4,128,128], index: 4, kind: input, shape index: {}]   ;;  %s742_s5 = inlined_call_operand.vmem [shape: f32[4,1,128], index: 5, kind: input, shape index: {}]   ;;  %s743_s6 = inlined_call_operand.hbm [shape: f32[8,128], index: 6, kind: output, shape index: {}]  }
   0x1   :  { %14 = vsyncpa [#allocation7], 0  ;;  %s553_s21 = smov [#allocation5]   ;;  %s481_s25 = scalar_lea.hbm %s741_s4, 8192 }
   0x2   :  { %s24_s22 = sshll.u32 %s553_s21, 4  ;;  %p482_p0 = scmp.ne.s32.totalorder %s741_s4, %s481_s25  ;;  %s25_s22 = int_to_ptr.vmem [resolvable:$true] %s24_s22 }
   0x3   :  { %p485_p1 = scmp.lt.u32.totalorder %s481_s25, %s741_s4 }
   0x5   :  { %p487_p2 = pnand %p485_p1, %p482_p0 }
   0x7   :  { %490 = shalt.err (!%p487_p2)
}
   0x8   :  { %s491_s30 = scalar_lea.vmem %s25_s22, 8192  ;;  %p496_p4 = scmp.lt.s32.totalorder %s25_s22, %s25_s22 }
   0x9   :  { %p492_p3 = scmp.ne.s32.totalorder %s25_s22, %s491_s30  ;;  %p497_p5 = scmp.lt.s32.totalorder %s491_s30, %s491_s30 }
   0xb   :  { %p498_p6 = por %p497_p5, %p496_p4 }
   0xd   :  { %p499_p7 = pnand %p498_p6, %p492_p3 }
   0xf   :  { %502 = shalt.err (!%p499_p7)
}
  0x10   :  { %s554_s7 = smov 128   ;;  %s555_s8 = smov 8  }
  0x11   :  { %30 = dma.hbm_to_vmem [thread:$0]  %s741_s4, 8192, %s25_s22, [#allocation6], %s554_s7, %s554_s7, %s555_s8  }
  0x12   :  { %537 = dma.done.wait [#allocation6], 8192  }
  0x13   :  { %538 = vsyncadd [#allocation6], 4294959104  ;;  %v614_v0 = vld [vmem:[%s740_s3] sm:$0xff]  ;;  %p287_p8 = scmp.ne.s32.totalorder %s737_s0, %s738_s1 }
  0x14   :  { %s288_s19 = sshll.u32 (!%p287_p8), %s737_s0, 7  ;;  %v556_v1 = vmov (!%p287_p8), 0.0|0.0   ;;  %vm557_vm0 = vmmov (!%p287_p8), 0   ;;  %v558_v2 = vmov (!%p287_p8), 0.0   ;;  %s61_s23 = scalar_lea.vmem (!%p287_p8), %s742_s5, %s737_s0 }
  0x15   :  { %42 = sbr.rel (%p287_p8) target bundleno = 271 (0x10f), region = 25  ;;  %397 = vmatprep.subr.bf16.mxu0 (!%p287_p8), %v556_v1  ;;  %359 = vmatprep.mubr.msk.f32.mxu0 (!%p287_p8), %vm557_vm0, %v558_v2  ;;  %s625_s4 = scalar_lea.vmem (!%p287_p8), [#allocation5], %s288_s19  ;;  %v289_v27 = vld [vmem:[%s61_s23] ss:$0 sm:$0xff] (!%p287_p8) }
  0x16   :  { %v45_v3 = vld [vmem:[%s625_s4] sm:$0xff] (!%p287_p8)  ;;  %v46_v4 = vld [vmem:[%s625_s4 + $0x8] sm:$0xff] (!%p287_p8)  ;;  %v47_v5 = vld [vmem:[%s625_s4 + $0x10] sm:$0xff] (!%p287_p8) }
  0x17   :  { %v398_v6 = vpack.c.bf16 (!%p287_p8), %v46_v4, %v45_v3  ;;  %v48_v7 = vld [vmem:[%s625_s4 + $0x18] sm:$0xff] (!%p287_p8)  ;;  %v49_v9 = vld [vmem:[%s625_s4 + $0x20] sm:$0xff] (!%p287_p8)  ;;  %v50_v10 = vld [vmem:[%s625_s4 + $0x28] sm:$0xff] (!%p287_p8) }
  0x18   :  { %v401_v8 = vpack.c.bf16 (!%p287_p8), %v48_v7, %v47_v5  ;;  %v404_v11 = vpack.c.bf16 (!%p287_p8), %v50_v10, %v49_v9  ;;  %v51_v12 = vld [vmem:[%s625_s4 + $0x30] sm:$0xff] (!%p287_p8)  ;;  %v52_v13 = vld [vmem:[%s625_s4 + $0x38] sm:$0xff] (!%p287_p8)  ;;  %v53_v15 = vld [vmem:[%s625_s4 + $0x40] sm:$0xff] (!%p287_p8) }
  0x19   :  { %399 = vmatpush3.bf16.msra.mxu0 (!%p287_p8), %v398_v6  ;;  %v407_v14 = vpack.c.bf16 (!%p287_p8), %v52_v13, %v51_v12  ;;  %v54_v16 = vld [vmem:[%s625_s4 + $0x48] sm:$0xff] (!%p287_p8)  ;;  %v55_v18 = vld [vmem:[%s625_s4 + $0x50] sm:$0xff] (!%p287_p8)  ;;  %v56_v19 = vld [vmem:[%s625_s4 + $0x58] sm:$0xff] (!%p287_p8) }
  0x1a   :  { %400 = vmatprep.subr.bf16.mxu0 (!%p287_p8), %v556_v1  ;;  %v410_v17 = vpack.c.bf16 (!%p287_p8), %v54_v16, %v53_v15  ;;  %v413_v20 = vpack.c.bf16 (!%p287_p8), %v56_v19, %v55_v18  ;;  %v57_v21 = vld [vmem:[%s625_s4 + $0x60] sm:$0xff] (!%p287_p8)  ;;  %v58_v22 = vld [vmem:[%s625_s4 + $0x68] sm:$0xff] (!%p287_p8)  ;;  %v59_v24 = vld [vmem:[%s625_s4 + $0x70] sm:$0xff] (!%p287_p8) }
  0x1b   :  { %v416_v23 = vpack.c.bf16 (!%p287_p8), %v58_v22, %v57_v21  ;;  %v60_v25 = vld [vmem:[%s625_s4 + $0x78] sm:$0xff] (!%p287_p8) }
  0x1c   :  { %v419_v26 = vpack.c.bf16 %v60_v25, %v59_v24 }
  0x1d   :  { %402 = vmatpush3.bf16.msra.mxu0 %v401_v8 }
  0x1e   :  { %403 = vmatprep.subr.bf16.mxu0 %v556_v1 }
  0x21   :  { %405 = vmatpush3.bf16.msra.mxu0 %v404_v11 }
  0x22   :  { %406 = vmatprep.subr.bf16.mxu0 %v556_v1 }
  0x25   :  { %408 = vmatpush3.bf16.msra.mxu0 %v407_v14 }
  0x26   :  { %409 = vmatprep.subr.bf16.mxu0 %v556_v1 }
  0x29   :  { %411 = vmatpush3.bf16.msra.mxu0 %v410_v17 }
  0x2a   :  { %412 = vmatprep.subr.bf16.mxu0 %v556_v1 }
  0x2d   :  { %414 = vmatpush3.bf16.msra.mxu0 %v413_v20 }
  0x2e   :  { %415 = vmatprep.subr.bf16.mxu0 %v556_v1 }
  0x31   :  { %417 = vmatpush3.bf16.msra.mxu0 %v416_v23 }
  0x32   :  { %418 = vmatprep.subr.bf16.mxu0 %v556_v1 }
  0x35   :  { %420 = vmatpush3.bf16.msra.mxu0 %v419_v26 }
  0x38   :  { %360 = vmatmul.mubr.f32.vlgmr.msra.gmra.mrb[0].mxu0 %v614_v0 }
 0x10b   :  { %v135_v28 = vpop.f32.mrb[0].mxu0 }
 0x10c   :  { %v136_v29 = vadd.f32 %v289_v27, %v135_v28  ;;  %v361_v30 = vpop.f32.mrb[1].mxu0 }
 0x10e   :  { %139 = vst [vmem:[#allocation8] sm:$0xff] %v136_v29 }
 0x10f PF:  { %p290_p9 = scmp.eq.s32.totalorder %s737_s0, %s738_s1 }
 0x110   :  { %v659_v31 = vld [vmem:[%s739_s2] sm:$0xff] (!%p290_p9)  ;;  %s145_s8 = sadd.s32 (!%p290_p9), 1, %s738_s1  ;;  %v671_v32 = vmov (!%p290_p9), 0.0  }
 0x111   :  { %143 = sbr.rel (%p290_p9) target bundleno = 540 (0x21c), region = 29  ;;  %p280_p10 = scmp.ge.s32.totalorder (!%p290_p9), %s737_s0, %s145_s8 }
 0x118   :  { %282 = sbr.rel (%p280_p10) target bundleno = 539 (0x21b), region = 53  ;;  %v673_v33 = vmov (!%p280_p10), 0.0  }
 0x11f LB: > { %v559_v34 = vmov 0.0|0.0   ;;  %vm560_vm1 = vmmov 0   ;;  %v561_v35 = vmov 0.0   ;;  %s291_s14 = sshll.u32 %s547_s0, 7  ;;  %v562_v36 = vmov 0   ;;  %s171_s18 = scalar_lea.vmem %s742_s5, %s547_s0  ;;  %s547_s0 = sphi %s737_s0, %s149_s0   ;;  %v543_v33 = vphi %v673_v33, %v744_v33  }
 0x120   : > { %421 = vmatprep.subr.bf16.mxu0 %v559_v34  ;;  %394 = vmatprep.mubr.msk.f32.mxu0 %vm560_vm1, %v561_v35  ;;  %v249_v37 = vstv %s547_s0  ;;  %s689_s15 = scalar_lea.vmem [#allocation5], %s291_s14  ;;  %v292_v1 = vld [vmem:[%s171_s18] ss:$0 sm:$0xff]  ;;  %s149_s0 = sadd.s32 1, %s547_s0  }
 0x121   : > { %480 = vset.pattern.permute.xlu0 %v562_v36  ;;  %vm250_vm2 = vcmp.eq.s32.totalorder %v659_v31, %v249_v37  ;;  %v155_v38 = vld [vmem:[%s689_s15] sm:$0xff]  ;;  %v156_v39 = vld [vmem:[%s689_s15 + $0x8] sm:$0xff]  ;;  %v157_v40 = vld [vmem:[%s689_s15 + $0x10] sm:$0xff]  ;;  %p148_p11 = scmp.ge.s32.totalorder %s149_s0, %s145_s8 }
 0x122   : > { %v251_v41 = vsel %vm250_vm2, 1, %v562_v36  ;;  %v422_v42 = vpack.c.bf16 %v156_v39, %v155_v38  ;;  %v158_v43 = vld [vmem:[%s689_s15 + $0x18] sm:$0xff]  ;;  %v159_v45 = vld [vmem:[%s689_s15 + $0x20] sm:$0xff]  ;;  %v160_v46 = vld [vmem:[%s689_s15 + $0x28] sm:$0xff] }
 0x123   : > { %253 = vperm.xlu0 %480, %v251_v41   ;;  %v425_v44 = vpack.c.bf16 %v158_v43, %v157_v40  ;;  %v428_v47 = vpack.c.bf16 %v160_v46, %v159_v45  ;;  %v161_v48 = vld [vmem:[%s689_s15 + $0x30] sm:$0xff]  ;;  %v162_v49 = vld [vmem:[%s689_s15 + $0x38] sm:$0xff]  ;;  %v163_v51 = vld [vmem:[%s689_s15 + $0x40] sm:$0xff] }
 0x124   : > { %423 = vmatpush3.bf16.msra.mxu0 %v422_v42  ;;  %v431_v50 = vpack.c.bf16 %v162_v49, %v161_v48  ;;  %v164_v52 = vld [vmem:[%s689_s15 + $0x48] sm:$0xff]  ;;  %v165_v54 = vld [vmem:[%s689_s15 + $0x50] sm:$0xff]  ;;  %v166_v55 = vld [vmem:[%s689_s15 + $0x58] sm:$0xff] }
 0x125   : > { %424 = vmatprep.subr.bf16.mxu0 %v559_v34  ;;  %v434_v53 = vpack.c.bf16 %v164_v52, %v163_v51  ;;  %v437_v56 = vpack.c.bf16 %v166_v55, %v165_v54  ;;  %v167_v57 = vld [vmem:[%s689_s15 + $0x60] sm:$0xff]  ;;  %v168_v58 = vld [vmem:[%s689_s15 + $0x68] sm:$0xff]  ;;  %v169_v60 = vld [vmem:[%s689_s15 + $0x70] sm:$0xff] }
 0x126   : > { %v440_v59 = vpack.c.bf16 %v168_v58, %v167_v57  ;;  %v170_v61 = vld [vmem:[%s689_s15 + $0x78] sm:$0xff] }
 0x127   : > { %v443_v62 = vpack.c.bf16 %v170_v61, %v169_v60 }
 0x128   : > { %426 = vmatpush3.bf16.msra.mxu0 %v425_v44 }
 0x129   : > { %427 = vmatprep.subr.bf16.mxu0 %v559_v34 }
 0x12c   : > { %429 = vmatpush3.bf16.msra.mxu0 %v428_v47 }
 0x12d   : > { %430 = vmatprep.subr.bf16.mxu0 %v559_v34 }
 0x130   : > { %432 = vmatpush3.bf16.msra.mxu0 %v431_v50 }
 0x131   : > { %433 = vmatprep.subr.bf16.mxu0 %v559_v34 }
 0x134   : > { %435 = vmatpush3.bf16.msra.mxu0 %v434_v53 }
 0x135   : > { %436 = vmatprep.subr.bf16.mxu0 %v559_v34 }
 0x138   : > { %438 = vmatpush3.bf16.msra.mxu0 %v437_v56 }
 0x139   : > { %439 = vmatprep.subr.bf16.mxu0 %v559_v34 }
 0x13c   : > { %441 = vmatpush3.bf16.msra.mxu0 %v440_v59 }
 0x13d   : > { %442 = vmatprep.subr.bf16.mxu0 %v559_v34 }
 0x140   : > { %444 = vmatpush3.bf16.msra.mxu0 %v443_v62 }
 0x143   : > { %395 = vmatmul.mubr.f32.vlgmr.msra.gmra.mrb[0].mxu0 %v614_v0 }
 0x1a2   : > { %v254_v63 = vpop.permute.xlu0 %253 }
 0x1a3   : > { %vm255_vm3 = vcmp.eq.s32.totalorder %v254_v63, 1 }
 0x214   :  { %151 = sbr.rel (!%p148_p11) target bundleno = 287 (0x11f), region = 59 }
 0x216   : > { %v245_v2 = vpop.f32.mrb[0].mxu0 }
 0x217   : > { %v246_v3 = vadd.f32 %v292_v1, %v245_v2  ;;  %v396_v4 = vpop.f32.mrb[1].mxu0 }
 0x219   : > { %v256_v5 = vsel %vm255_vm3, %v246_v3, %v543_v33  }
 0x21a   : > { %v744_v33 = vmov %v256_v5  ;;  %v745_v32 = vmov (%p148_p11), %v256_v5 }
 0x21b PF:  { %257 = vst [vmem:[#allocation8] sm:$0xff] %v551_v32  ;;  %v551_v32 = vphi %v671_v32, %v745_v32  }
 0x21c PF:  { %s563_s3 = smov [#allocation8]  }
 0x21d   :  { %s264_s20 = sshll.u32 %s563_s3, 4  ;;  %s265_s20 = int_to_ptr.vmem [resolvable:$true] %s264_s20 }
 0x21e   :  { %s503_s21 = scalar_lea.vmem %s265_s20, 128  ;;  %p508_p13 = scmp.lt.s32.totalorder %s265_s20, %s265_s20 }
 0x21f   :  { %p504_p12 = scmp.ne.s32.totalorder %s265_s20, %s503_s21  ;;  %p509_p0 = scmp.lt.s32.totalorder %s503_s21, %s503_s21 }
 0x221   :  { %p510_p1 = por %p509_p0, %p508_p13 }
 0x223   :  { %p511_p2 = pnand %p510_p1, %p504_p12 }
 0x225   :  { %514 = shalt.err (!%p511_p2)
}
 0x226   :  { %s515_s1 = scalar_lea.hbm %s743_s6, 128 }
 0x227   :  { %p516_p3 = scmp.ne.s32.totalorder %s743_s6, %s515_s1  ;;  %p519_p4 = scmp.lt.u32.totalorder %s515_s1, %s743_s6 }
 0x229   :  { %p521_p5 = pnand %p519_p4, %p516_p3 }
 0x22b   :  { %524 = shalt.err (!%p521_p5)
}
 0x22c   :  { %267 = dma.vmem_to_hbm [thread:$0]  %s265_s20, 128, %s743_s6, [#allocation7]  }
 0x22d   :  { %539 = dma.done.wait [#allocation7], 128  }
 0x22e   :  { %540 = vsyncadd [#allocation7], 4294967168 }
 0x22f   :  { %271 = vsyncpa [#allocation6], 1 }
 0x230   :  { %272 = vsyncpa [#allocation7], 1 }

// kernel: tpu_custom_call.1
= control target key start
LH: loop header
LB: loop body
LE: loop exit
PB: predicated region body
PF: predicated region fallthrough
CT: control target
= control target key end

     0   :  { %13 = vsyncpa [#allocation6], 0  ;;  %s737_s0 = inlined_call_operand.<no memory space> [shape: s32[1], index: 0, kind: input, shape index: {}]   ;;  %s738_s1 = inlined_call_operand.<no memory space> [shape: s32[1], index: 1, kind: input, shape index: {}]   ;;  %s739_s2 = inlined_call_operand.vmem [shape: s32[8,1], index: 2, kind: input, shape index: {}]   ;;  %s740_s3 = inlined_call_operand.vmem [shape: f32[8,128], index: 3, kind: input, shape index: {}]   ;;  %s741_s4 = inlined_call_operand.hbm [shape: f32[4,128,128], index: 4, kind: input, shape index: {}]   ;;  %s742_s5 = inlined_call_operand.vmem [shape: f32[4,1,128], index: 5, kind: input, shape index: {}]   ;;  %s743_s6 = inlined_call_operand.hbm [shape: f32[8,128], index: 6, kind: output, shape index: {}]  }
   0x1   :  { %14 = vsyncpa [#allocation7], 0  ;;  %s553_s21 = smov [#allocation5]   ;;  %s481_s25 = scalar_lea.hbm %s741_s4, 8192 }
   0x2   :  { %s24_s22 = sshll.u32 %s553_s21, 4  ;;  %p482_p0 = scmp.ne.s32.totalorder %s741_s4, %s481_s25  ;;  %s25_s22 = int_to_ptr.vmem [resolvable:$true] %s24_s22 }
   0x3   :  { %p485_p1 = scmp.lt.u32.totalorder %s481_s25, %s741_s4 }
   0x5   :  { %p487_p2 = pnand %p485_p1, %p482_p0 }
   0x7   :  { %490 = shalt.err (!%p487_p2)
}
   0x8   :  { %s491_s30 = scalar_lea.vmem %s25_s22, 8192  ;;  %p496_p4 = scmp.lt.s32.totalorder %s25_s22, %s25_s22 }
   0x9   :  { %p492_p3 = scmp.ne.s32.totalorder %s25_s22, %s491_s30  ;;  %p497_p5 = scmp.lt.s32.totalorder %s491_s30, %s491_s30 }
   0xb   :  { %p498_p6 = por %p497_p5, %p496_p4 }
   0xd   :  { %p499_p7 = pnand %p498_p6, %p492_p3 }
   0xf   :  { %502 = shalt.err (!%p499_p7)
}
  0x10   :  { %s554_s7 = smov 128   ;;  %s555_s8 = smov 8  }
  0x11   :  { %30 = dma.hbm_to_vmem [thread:$0]  %s741_s4, 8192, %s25_s22, [#allocation6], %s554_s7, %s554_s7, %s555_s8  }
  0x12   :  { %537 = dma.done.wait [#allocation6], 8192  }
  0x13   :  { %538 = vsyncadd [#allocation6], 4294959104  ;;  %v614_v0 = vld [vmem:[%s740_s3] sm:$0xff]  ;;  %p287_p8 = scmp.ne.s32.totalorder %s737_s0, %s738_s1 }
  0x14   :  { %s288_s19 = sshll.u32 (!%p287_p8), %s737_s0, 7  ;;  %v556_v1 = vmov (!%p287_p8), 0.0|0.0   ;;  %vm557_vm0 = vmmov (!%p287_p8), 0   ;;  %v558_v2 = vmov (!%p287_p8), 0.0   ;;  %s61_s23 = scalar_lea.vmem (!%p287_p8), %s742_s5, %s737_s0 }
  0x15   :  { %42 = sbr.rel (%p287_p8) target bundleno = 271 (0x10f), region = 25  ;;  %397 = vmatprep.subr.bf16.mxu0 (!%p287_p8), %v556_v1  ;;  %359 = vmatprep.mubr.msk.f32.mxu0 (!%p287_p8), %vm557_vm0, %v558_v2  ;;  %s625_s4 = scalar_lea.vmem (!%p287_p8), [#allocation5], %s288_s19  ;;  %v289_v27 = vld [vmem:[%s61_s23] ss:$0 sm:$0xff] (!%p287_p8) }
  0x16   :  { %v45_v3 = vld [vmem:[%s625_s4] sm:$0xff] (!%p287_p8)  ;;  %v46_v4 = vld [vmem:[%s625_s4 + $0x8] sm:$0xff] (!%p287_p8)  ;;  %v47_v5 = vld [vmem:[%s625_s4 + $0x10] sm:$0xff] (!%p287_p8) }
  0x17   :  { %v398_v6 = vpack.c.bf16 (!%p287_p8), %v46_v4, %v45_v3  ;;  %v48_v7 = vld [vmem:[%s625_s4 + $0x18] sm:$0xff] (!%p287_p8)  ;;  %v49_v9 = vld [vmem:[%s625_s4 + $0x20] sm:$0xff] (!%p287_p8)  ;;  %v50_v10 = vld [vmem:[%s625_s4 + $0x28] sm:$0xff] (!%p287_p8) }
  0x18   :  { %v401_v8 = vpack.c.bf16 (!%p287_p8), %v48_v7, %v47_v5  ;;  %v404_v11 = vpack.c.bf16 (!%p287_p8), %v50_v10, %v49_v9  ;;  %v51_v12 = vld [vmem:[%s625_s4 + $0x30] sm:$0xff] (!%p287_p8)  ;;  %v52_v13 = vld [vmem:[%s625_s4 + $0x38] sm:$0xff] (!%p287_p8)  ;;  %v53_v15 = vld [vmem:[%s625_s4 + $0x40] sm:$0xff] (!%p287_p8) }
  0x19   :  { %399 = vmatpush3.bf16.msra.mxu0 (!%p287_p8), %v398_v6  ;;  %v407_v14 = vpack.c.bf16 (!%p287_p8), %v52_v13, %v51_v12  ;;  %v54_v16 = vld [vmem:[%s625_s4 + $0x48] sm:$0xff] (!%p287_p8)  ;;  %v55_v18 = vld [vmem:[%s625_s4 + $0x50] sm:$0xff] (!%p287_p8)  ;;  %v56_v19 = vld [vmem:[%s625_s4 + $0x58] sm:$0xff] (!%p287_p8) }
  0x1a   :  { %400 = vmatprep.subr.bf16.mxu0 (!%p287_p8), %v556_v1  ;;  %v410_v17 = vpack.c.bf16 (!%p287_p8), %v54_v16, %v53_v15  ;;  %v413_v20 = vpack.c.bf16 (!%p287_p8), %v56_v19, %v55_v18  ;;  %v57_v21 = vld [vmem:[%s625_s4 + $0x60] sm:$0xff] (!%p287_p8)  ;;  %v58_v22 = vld [vmem:[%s625_s4 + $0x68] sm:$0xff] (!%p287_p8)  ;;  %v59_v24 = vld [vmem:[%s625_s4 + $0x70] sm:$0xff] (!%p287_p8) }
  0x1b   :  { %v416_v23 = vpack.c.bf16 (!%p287_p8), %v58_v22, %v57_v21  ;;  %v60_v25 = vld [vmem:[%s625_s4 + $0x78] sm:$0xff] (!%p287_p8) }
  0x1c   :  { %v419_v26 = vpack.c.bf16 %v60_v25, %v59_v24 }
  0x1d   :  { %402 = vmatpush3.bf16.msra.mxu0 %v401_v8 }
  0x1e   :  { %403 = vmatprep.subr.bf16.mxu0 %v556_v1 }
  0x21   :  { %405 = vmatpush3.bf16.msra.mxu0 %v404_v11 }
  0x22   :  { %406 = vmatprep.subr.bf16.mxu0 %v556_v1 }
  0x25   :  { %408 = vmatpush3.bf16.msra.mxu0 %v407_v14 }
  0x26   :  { %409 = vmatprep.subr.bf16.mxu0 %v556_v1 }
  0x29   :  { %411 = vmatpush3.bf16.msra.mxu0 %v410_v17 }
  0x2a   :  { %412 = vmatprep.subr.bf16.mxu0 %v556_v1 }
  0x2d   :  { %414 = vmatpush3.bf16.msra.mxu0 %v413_v20 }
  0x2e   :  { %415 = vmatprep.subr.bf16.mxu0 %v556_v1 }
  0x31   :  { %417 = vmatpush3.bf16.msra.mxu0 %v416_v23 }
  0x32   :  { %418 = vmatprep.subr.bf16.mxu0 %v556_v1 }
  0x35   :  { %420 = vmatpush3.bf16.msra.mxu0 %v419_v26 }
  0x38   :  { %360 = vmatmul.mubr.f32.vlgmr.msra.gmra.mrb[0].mxu0 %v614_v0 }
 0x10b   :  { %v135_v28 = vpop.f32.mrb[0].mxu0 }
 0x10c   :  { %v136_v29 = vadd.f32 %v289_v27, %v135_v28  ;;  %v361_v30 = vpop.f32.mrb[1].mxu0 }
 0x10e   :  { %139 = vst [vmem:[#allocation8] sm:$0xff] %v136_v29 }
 0x10f PF:  { %p290_p9 = scmp.eq.s32.totalorder %s737_s0, %s738_s1 }
 0x110   :  { %v659_v31 = vld [vmem:[%s739_s2] sm:$0xff] (!%p290_p9)  ;;  %s145_s8 = sadd.s32 (!%p290_p9), 1, %s738_s1  ;;  %v671_v32 = vmov (!%p290_p9), 0.0  }
 0x111   :  { %143 = sbr.rel (%p290_p9) target bundleno = 540 (0x21c), region = 29  ;;  %p280_p10 = scmp.ge.s32.totalorder (!%p290_p9), %s737_s0, %s145_s8 }
 0x118   :  { %282 = sbr.rel (%p280_p10) target bundleno = 539 (0x21b), region = 53  ;;  %v673_v33 = vmov (!%p280_p10), 0.0  }
 0x11f LB: > { %v559_v34 = vmov 0.0|0.0   ;;  %vm560_vm1 = vmmov 0   ;;  %v561_v35 = vmov 0.0   ;;  %s291_s14 = sshll.u32 %s547_s0, 7  ;;  %v562_v36 = vmov 0   ;;  %s171_s18 = scalar_lea.vmem %s742_s5, %s547_s0  ;;  %s547_s0 = sphi %s737_s0, %s149_s0   ;;  %v543_v33 = vphi %v673_v33, %v744_v33  }
 0x120   : > { %421 = vmatprep.subr.bf16.mxu0 %v559_v34  ;;  %394 = vmatprep.mubr.msk.f32.mxu0 %vm560_vm1, %v561_v35  ;;  %v249_v37 = vstv %s547_s0  ;;  %s689_s15 = scalar_lea.vmem [#allocation5], %s291_s14  ;;  %v292_v1 = vld [vmem:[%s171_s18] ss:$0 sm:$0xff]  ;;  %s149_s0 = sadd.s32 1, %s547_s0  }
 0x121   : > { %480 = vset.pattern.permute.xlu0 %v562_v36  ;;  %vm250_vm2 = vcmp.eq.s32.totalorder %v659_v31, %v249_v37  ;;  %v155_v38 = vld [vmem:[%s689_s15] sm:$0xff]  ;;  %v156_v39 = vld [vmem:[%s689_s15 + $0x8] sm:$0xff]  ;;  %v157_v40 = vld [vmem:[%s689_s15 + $0x10] sm:$0xff]  ;;  %p148_p11 = scmp.ge.s32.totalorder %s149_s0, %s145_s8 }
 0x122   : > { %v251_v41 = vsel %vm250_vm2, 1, %v562_v36  ;;  %v422_v42 = vpack.c.bf16 %v156_v39, %v155_v38  ;;  %v158_v43 = vld [vmem:[%s689_s15 + $0x18] sm:$0xff]  ;;  %v159_v45 = vld [vmem:[%s689_s15 + $0x20] sm:$0xff]  ;;  %v160_v46 = vld [vmem:[%s689_s15 + $0x28] sm:$0xff] }
 0x123   : > { %253 = vperm.xlu0 %480, %v251_v41   ;;  %v425_v44 = vpack.c.bf16 %v158_v43, %v157_v40  ;;  %v428_v47 = vpack.c.bf16 %v160_v46, %v159_v45  ;;  %v161_v48 = vld [vmem:[%s689_s15 + $0x30] sm:$0xff]  ;;  %v162_v49 = vld [vmem:[%s689_s15 + $0x38] sm:$0xff]  ;;  %v163_v51 = vld [vmem:[%s689_s15 + $0x40] sm:$0xff] }
 0x124   : > { %423 = vmatpush3.bf16.msra.mxu0 %v422_v42  ;;  %v431_v50 = vpack.c.bf16 %v162_v49, %v161_v48  ;;  %v164_v52 = vld [vmem:[%s689_s15 + $0x48] sm:$0xff]  ;;  %v165_v54 = vld [vmem:[%s689_s15 + $0x50] sm:$0xff]  ;;  %v166_v55 = vld [vmem:[%s689_s15 + $0x58] sm:$0xff] }
 0x125   : > { %424 = vmatprep.subr.bf16.mxu0 %v559_v34  ;;  %v434_v53 = vpack.c.bf16 %v164_v52, %v163_v51  ;;  %v437_v56 = vpack.c.bf16 %v166_v55, %v165_v54  ;;  %v167_v57 = vld [vmem:[%s689_s15 + $0x60] sm:$0xff]  ;;  %v168_v58 = vld [vmem:[%s689_s15 + $0x68] sm:$0xff]  ;;  %v169_v60 = vld [vmem:[%s689_s15 + $0x70] sm:$0xff] }
 0x126   : > { %v440_v59 = vpack.c.bf16 %v168_v58, %v167_v57  ;;  %v170_v61 = vld [vmem:[%s689_s15 + $0x78] sm:$0xff] }
 0x127   : > { %v443_v62 = vpack.c.bf16 %v170_v61, %v169_v60 }
 0x128   : > { %426 = vmatpush3.bf16.msra.mxu0 %v425_v44 }
 0x129   : > { %427 = vmatprep.subr.bf16.mxu0 %v559_v34 }
 0x12c   : > { %429 = vmatpush3.bf16.msra.mxu0 %v428_v47 }
 0x12d   : > { %430 = vmatprep.subr.bf16.mxu0 %v559_v34 }
 0x130   : > { %432 = vmatpush3.bf16.msra.mxu0 %v431_v50 }
 0x131   : > { %433 = vmatprep.subr.bf16.mxu0 %v559_v34 }
 0x134   : > { %435 = vmatpush3.bf16.msra.mxu0 %v434_v53 }
 0x135   : > { %436 = vmatprep.subr.bf16.mxu0 %v559_v34 }
 0x138   : > { %438 = vmatpush3.bf16.msra.mxu0 %v437_v56 }
 0x139   : > { %439 = vmatprep.subr.bf16.mxu0 %v559_v34 }
 0x13c   : > { %441 = vmatpush3.bf16.msra.mxu0 %v440_v59 }
 0x13d   : > { %442 = vmatprep.subr.bf16.mxu0 %v559_v34 }
 0x140   : > { %444 = vmatpush3.bf16.msra.mxu0 %v443_v62 }
 0x143   : > { %395 = vmatmul.mubr.f32.vlgmr.msra.gmra.mrb[0].mxu0 %v614_v0 }
 0x1a2   : > { %v254_v63 = vpop.permute.xlu0 %253 }
 0x1a3   : > { %vm255_vm3 = vcmp.eq.s32.totalorder %v254_v63, 1 }
 0x214   :  { %151 = sbr.rel (!%p148_p11) target bundleno = 287 (0x11f), region = 59 }
 0x216   : > { %v245_v2 = vpop.f32.mrb[0].mxu0 }
 0x217   : > { %v246_v3 = vadd.f32 %v292_v1, %v245_v2  ;;  %v396_v4 = vpop.f32.mrb[1].mxu0 }
 0x219   : > { %v256_v5 = vsel %vm255_vm3, %v246_v3, %v543_v33  }
 0x21a   : > { %v744_v33 = vmov %v256_v5  ;;  %v745_v32 = vmov (%p148_p11), %v256_v5 }
 0x21b PF:  { %257 = vst [vmem:[#allocation8] sm:$0xff] %v551_v32  ;;  %v551_v32 = vphi %v671_v32, %v745_v32  }
 0x21c PF:  { %s563_s3 = smov [#allocation8]  }
 0x21d   :  { %s264_s20 = sshll.u32 %s563_s3, 4  ;;  %s265_s20 = int_to_ptr.vmem [resolvable:$true] %s264_s20 }
 0x21e   :  { %s503_s21 = scalar_lea.vmem %s265_s20, 128  ;;  %p508_p13 = scmp.lt.s32.totalorder %s265_s20, %s265_s20 }
 0x21f   :  { %p504_p12 = scmp.ne.s32.totalorder %s265_s20, %s503_s21  ;;  %p509_p0 = scmp.lt.s32.totalorder %s503_s21, %s503_s21 }
 0x221   :  { %p510_p1 = por %p509_p0, %p508_p13 }
 0x223   :  { %p511_p2 = pnand %p510_p1, %p504_p12 }
 0x225   :  { %514 = shalt.err (!%p511_p2)
}
 0x226   :  { %s515_s1 = scalar_lea.hbm %s743_s6, 128 }
 0x227   :  { %p516_p3 = scmp.ne.s32.totalorder %s743_s6, %s515_s1  ;;  %p519_p4 = scmp.lt.u32.totalorder %s515_s1, %s743_s6 }
 0x229   :  { %p521_p5 = pnand %p519_p4, %p516_p3 }
 0x22b   :  { %524 = shalt.err (!%p521_p5)
}
 0x22c   :  { %267 = dma.vmem_to_hbm [thread:$0]  %s265_s20, 128, %s743_s6, [#allocation7]  }
 0x22d   :  { %539 = dma.done.wait [#allocation7], 128  }
 0x22e   :  { %540 = vsyncadd [#allocation7], 4294967168 }
 0x22f   :  { %271 = vsyncpa [#allocation6], 1 }
 0x230   :  { %272 = vsyncpa [#allocation7], 1 }

</bundles_post_ra>
